<compile_context>
chip_gen: v5e
topology: v5e:2x2
jax: 0.10.0
libtpu: 0.0.40
codegen_flags: <defaults>
</compile_context>

<pallas_src>
import functools

import jax
import jax.numpy as jnp
from jax import lax
from jax.experimental import pallas as pl
from jax.experimental.pallas import tpu as pltpu


def _decoder_kernel(x_ref, a1_ref, b1_ref, a2_ref, b2_ref, uh_ref, uwc_ref,
                    out_ref, pad_ref, *, B, H, W, Cin, Cmid):
    """Process a block of B images.

    x_ref  : (B, H+2, W*Cin)     row-padded, lane-dense concat input
    a1_ref : (3, W*Cin, W*Cmid)  conv1 banded weights (one matrix per kernel row)
    b1_ref : (1, W*Cmid)         conv1 bias tiled across W
    a2_ref : (3, W*Cmid, W*Cmid) conv2 banded weights
    b2_ref : (1, W*Cmid)
    uh_ref : (2H, H)             bilinear row-interpolation matrix
    uwc_ref: (W*Cmid, 2W*Cmid)   bilinear col-interpolation x channel identity
    out_ref: (B, 2H, 2W*Cmid)    lane-dense output slab
    pad_ref: (B, H+2, W*Cmid)    VMEM scratch: y-padding for conv2
    """
    WCi = W * Cin
    WCm = W * Cmid
    BH = B * H

    def conv_rows(rows_fn, a_ref):
        # 3 banded matmuls; accumulator initialised by the first dot.
        acc = jnp.dot(rows_fn(0), a_ref[0], preferred_element_type=jnp.float32)
        acc = acc + jnp.dot(rows_fn(1), a_ref[1],
                            preferred_element_type=jnp.float32)
        acc = acc + jnp.dot(rows_fn(2), a_ref[2],
                            preferred_element_type=jnp.float32)
        return acc

    # ---- conv1 (3x3, pad=1) + ReLU : batch folded into the MXU M dim ----
    x_rows = lambda dy: x_ref[:, dy:dy + H, :].reshape(BH, WCi)
    act1 = jnp.maximum(conv_rows(x_rows, a1_ref) + b1_ref[...], 0.0)  # (BH,WCm)

    # ---- y-pad act1 for conv2: rewrite only the two halo rows + interior ----
    zrow = jnp.zeros((B, 1, WCm), jnp.float32)
    pad_ref[:, 0:1, :] = zrow
    pad_ref[:, H + 1:H + 2, :] = zrow
    pad_ref[:, 1:H + 1, :] = act1.reshape(B, H, WCm)

    # ---- conv2 (3x3, pad=1) + ReLU ----
    p_rows = lambda dy: pad_ref[:, dy:dy + H, :].reshape(BH, WCm)
    act2 = jnp.maximum(conv_rows(p_rows, a2_ref) + b2_ref[...], 0.0)  # (BH,WCm)

    # ---- bilinear x2 upsample (align_corners=True), transpose-free ----
    uh = uh_ref[...]                                    # (2H, H)
    uwc = uwc_ref[...]                                  # (WCm, 2W*Cmid)
    for b in range(B):
        a2b = act2[b * H:(b + 1) * H, :]                               # (H, WCm)
        tmp = jnp.dot(uh, a2b, preferred_element_type=jnp.float32)     # (2H, WCm)
        out_ref[b] = jnp.dot(tmp, uwc,
                             preferred_element_type=jnp.float32)       # (2H, 2W*Cmid)


def _band_weights(w, W):
    """HWIO conv weights (KH, KW, Ci, Co) -> banded (KH, W*Ci, W*Co) matrices.

    A[dy, s*Ci+ci, x*Co+co] = w[dy, s-x+KW//2, ci, co]; out-of-range dx taps
    stay zero, which implements the x-direction zero padding.
    """
    KH, KW, Ci, Co = w.shape
    k = jnp.arange(KW)
    s = jnp.arange(W)
    x = jnp.arange(W)
    sel = (s[None, :, None] == x[None, None, :] + k[:, None, None] - (KW // 2))
    sel = sel.astype(w.dtype)                              # (KW, W, W)
    a = jnp.einsum('ksx,dkio->dsixo', sel, w)              # (KH, W, Ci, W, Co)
    return a.reshape(KH, W * Ci, W * Co)


def _bilinear_matrix(n_in, n_out):
    """(n_out, n_in) interpolation matrix for align_corners=True bilinear."""
    if n_out == 1:
        return jnp.eye(1, n_in, dtype=jnp.float32)
    y = jnp.arange(n_out, dtype=jnp.float32)
    src = y * (n_in - 1) / (n_out - 1)
    i0 = jnp.floor(src).astype(jnp.int32)
    i1 = jnp.minimum(i0 + 1, n_in - 1)
    frac = src - i0.astype(jnp.float32)
    m = jnp.zeros((n_out, n_in), jnp.float32)
    m = m.at[jnp.arange(n_out), i0].add(1.0 - frac)
    m = m.at[jnp.arange(n_out), i1].add(frac)
    return m


def unet_decoder_layer(enc, dec, w1, b1, w2, b2, *, batch_block=None):
    """enc, dec: NCHW float32; w1/w2 HWIO.  Returns NCHW (N, Cmid, 2H, 2W)."""
    x = jnp.concatenate([enc, dec], axis=1)              # (N, Cin, H, W)
    x = jnp.transpose(x, (0, 2, 3, 1))                   # NHWC
    N, H, W, Cin = x.shape
    Cmid = w1.shape[-1]
    WCi, WCm, WCo = W * Cin, W * Cmid, 2 * W * Cmid

    # Lane-dense input: fold (W, C) into the lane axis; pad rows (y) only --
    # the x-direction zero padding lives inside the banded weight matrices.
    xr = jnp.pad(x.reshape(N, H, WCi), ((0, 0), (1, 1), (0, 0)))  # (N, H+2, WCi)

    a1 = _band_weights(w1, W)                            # (3, WCi, WCm)
    a2 = _band_weights(w2, W)                            # (3, WCm, WCm)
    b1r = jnp.tile(b1, W)[None, :]                       # (1, WCm)
    b2r = jnp.tile(b2, W)[None, :]                       # (1, WCm)
    uh = _bilinear_matrix(H, 2 * H)                      # (2H, H)
    uw = _bilinear_matrix(W, 2 * W)                      # (2W, W)
    uwc = jnp.einsum('Xw,cd->wcXd', uw,
                     jnp.eye(Cmid, dtype=jnp.float32)).reshape(WCm, WCo)

    B = N if batch_block is None else batch_block        # images per grid step
    assert N % B == 0
    # Note: for large decoder levels (big H/W/N) a row-tiled grid axis with a
    # 1-row halo would be used instead of whole-image blocks (v7x 64 MiB VMEM).
    kernel = functools.partial(_decoder_kernel, B=B, H=H, W=W, Cin=Cin,
                               Cmid=Cmid)

    out = pl.pallas_call(
        kernel,
        out_shape=jax.ShapeDtypeStruct((N, 2 * H, WCo), jnp.float32),
        grid_spec=pltpu.PrefetchScalarGridSpec(
            num_scalar_prefetch=0,
            grid=(N // B,),
            in_specs=[
                pl.BlockSpec((B, H + 2, WCi), lambda i: (i, 0, 0)),
                pl.BlockSpec((3, WCi, WCm), lambda i: (0, 0, 0)),
                pl.BlockSpec((1, WCm), lambda i: (0, 0)),
                pl.BlockSpec((3, WCm, WCm), lambda i: (0, 0, 0)),
                pl.BlockSpec((1, WCm), lambda i: (0, 0)),
                pl.BlockSpec((2 * H, H), lambda i: (0, 0)),
                pl.BlockSpec((WCm, WCo), lambda i: (0, 0)),
            ],
            out_specs=pl.BlockSpec((B, 2 * H, WCo), lambda i: (i, 0, 0)),
            scratch_shapes=[pltpu.VMEM((B, H + 2, WCm), jnp.float32)],
        ),
        compiler_params=pltpu.CompilerParams(
            dimension_semantics=("parallel",),   # batch blocks are independent
            vmem_limit_bytes=32 * 1024 * 1024,
        ),
    )(xr, a1, b1r, a2, b2r, uh, uwc)

    out = out.reshape(N, 2 * H, 2 * W, Cmid)             # split lanes -> (X, C)
    return jnp.transpose(out, (0, 3, 1, 2))              # back to NCHW


def _reference(enc, dec, w1, b1, w2, b2):
    """Pure-JAX reference of the same forward pass (for sanity checking)."""
    x = jnp.concatenate([enc, dec], axis=1)
    x = jnp.transpose(x, (0, 2, 3, 1))
    dn = ('NHWC', 'HWIO', 'NHWC')
    y = lax.conv_general_dilated(x, w1, (1, 1), 'SAME', dimension_numbers=dn)
    y = jnp.maximum(y + b1, 0.0)
    y = lax.conv_general_dilated(y, w2, (1, 1), 'SAME', dimension_numbers=dn)
    y = jnp.maximum(y + b2, 0.0)
    H, W = y.shape[1], y.shape[2]
    uh = _bilinear_matrix(H, 2 * H)
    uw = _bilinear_matrix(W, 2 * W)
    y = jnp.einsum('Yh,nhwc->nYwc', uh, y)
    y = jnp.einsum('Xw,nYwc->nYXc', uw, y)
    return jnp.transpose(y, (0, 3, 1, 2))


if __name__ == "__main__":
    # Module config: lvl = 2, no_channels = [4, 8]
    #   in_channels  = no_channels[1] * 2 = 16  (concat of two 8-channel maps)
    #   out_channels = no_channels[0]     = 4
    lvl = 2
    no_channels = [4, 8]
    N, C_enc, H, W = 2, no_channels[lvl - 1], 16, 16
    Cin = C_enc * 2
    Cmid = no_channels[lvl - 2]

    key = jax.random.PRNGKey(0)
    k_enc, k_dec, k_w1, k_b1, k_w2, k_b2 = jax.random.split(key, 6)

    enc = jax.random.normal(k_enc, (N, C_enc, H, W), jnp.float32)
    dec = jax.random.normal(k_dec, (N, C_enc, H, W), jnp.float32)

    # Deterministic synthetic parameters (HWIO conv weights).
    w1 = 0.1 * jax.random.normal(k_w1, (3, 3, Cin, Cmid), jnp.float32)
    b1 = 0.1 * jax.random.normal(k_b1, (Cmid,), jnp.float32)
    w2 = 0.1 * jax.random.normal(k_w2, (3, 3, Cmid, Cmid), jnp.float32)
    b2 = 0.1 * jax.random.normal(k_b2, (Cmid,), jnp.float32)

    out = jax.block_until_ready(unet_decoder_layer(enc, dec, w1, b1, w2, b2))
    ref = jax.block_until_ready(_reference(enc, dec, w1, b1, w2, b2))

    assert out.shape == (N, Cmid, 2 * H, 2 * W), out.shape
    assert jnp.max(jnp.abs(out - ref)) < 1e-4

    print("KERNEL_OK")
</pallas_src>

<mosaic_0001>
module attributes {stable_mosaic.version = 11 : i64} {
  func.func @_decoder_kernel(%arg0: i32, %arg1: memref<2x18x256xf32, #tpu.memory_space<vmem>>, %arg2: memref<3x256x64xf32, #tpu.memory_space<vmem>>, %arg3: memref<1x64xf32, #tpu.memory_space<vmem>>, %arg4: memref<3x64x64xf32, #tpu.memory_space<vmem>>, %arg5: memref<1x64xf32, #tpu.memory_space<vmem>>, %arg6: memref<32x16xf32, #tpu.memory_space<vmem>>, %arg7: memref<64x128xf32, #tpu.memory_space<vmem>>, %arg8: memref<2x32x128xf32, #tpu.memory_space<vmem>>, %arg9: memref<2x18x64xf32, #tpu.memory_space<vmem>>) attributes {dimension_semantics = [#tpu.dimension_semantics<parallel>], iteration_bounds = array<i64: 1>, scalar_prefetch = 0 : i64, scratch_operands = 1 : i64, tpu.core_type = #tpu.core_type<tc>, window_params = [{transform_indices = @transform_0, window_bounds = array<i64: 2, 18, 256>}, {pipeline_mode = #tpu.pipeline_mode<synchronous>, transform_indices = @transform_1, window_bounds = array<i64: 3, 256, 64>}, {pipeline_mode = #tpu.pipeline_mode<synchronous>, transform_indices = @transform_2, window_bounds = array<i64: 1, 64>}, {pipeline_mode = #tpu.pipeline_mode<synchronous>, transform_indices = @transform_3, window_bounds = array<i64: 3, 64, 64>}, {pipeline_mode = #tpu.pipeline_mode<synchronous>, transform_indices = @transform_4, window_bounds = array<i64: 1, 64>}, {pipeline_mode = #tpu.pipeline_mode<synchronous>, transform_indices = @transform_5, window_bounds = array<i64: 32, 16>}, {pipeline_mode = #tpu.pipeline_mode<synchronous>, transform_indices = @transform_6, window_bounds = array<i64: 64, 128>}, {transform_indices = @transform_7, window_bounds = array<i64: 2, 32, 128>}]} {
    %c0 = arith.constant 0 : index
    %c0_0 = arith.constant 0 : index
    %c0_1 = arith.constant 0 : index
    %0 = vector.load %arg1[%c0, %c0_0, %c0_1] : memref<2x18x256xf32, #tpu.memory_space<vmem>>, vector<2x16x256xf32>
    %1 = vector.shape_cast %0 : vector<2x16x256xf32> to vector<32x256xf32>
    %c0_2 = arith.constant 0 : index
    %c0_3 = arith.constant 0 : index
    %c0_4 = arith.constant 0 : index
    %2 = vector.load %arg2[%c0_2, %c0_3, %c0_4] : memref<3x256x64xf32, #tpu.memory_space<vmem>>, vector<1x256x64xf32>
    %3 = vector.shape_cast %2 : vector<1x256x64xf32> to vector<256x64xf32>
    %cst = arith.constant dense<0.000000e+00> : vector<32x64xf32>
    %4 = tpu.matmul %1, %3, %cst {dimension_numbers = #tpu.dot_dimension_numbers<[1], [0], [0], [1], [0, 0, 1, 1], [], []>} : vector<32x256xf32>, vector<256x64xf32>, vector<32x64xf32> -> vector<32x64xf32>
    %c0_5 = arith.constant 0 : index
    %c1 = arith.constant 1 : index
    %c0_6 = arith.constant 0 : index
    %5 = vector.load %arg1[%c0_5, %c1, %c0_6] : memref<2x18x256xf32, #tpu.memory_space<vmem>>, vector<2x16x256xf32>
    %6 = vector.shape_cast %5 : vector<2x16x256xf32> to vector<32x256xf32>
    %c1_7 = arith.constant 1 : index
    %c0_8 = arith.constant 0 : index
    %c0_9 = arith.constant 0 : index
    %7 = vector.load %arg2[%c1_7, %c0_8, %c0_9] : memref<3x256x64xf32, #tpu.memory_space<vmem>>, vector<1x256x64xf32>
    %8 = vector.shape_cast %7 : vector<1x256x64xf32> to vector<256x64xf32>
    %cst_10 = arith.constant dense<0.000000e+00> : vector<32x64xf32>
    %9 = tpu.matmul %6, %8, %cst_10 {dimension_numbers = #tpu.dot_dimension_numbers<[1], [0], [0], [1], [0, 0, 1, 1], [], []>} : vector<32x256xf32>, vector<256x64xf32>, vector<32x64xf32> -> vector<32x64xf32>
    %10 = arith.addf %4, %9 : vector<32x64xf32>
    %c0_11 = arith.constant 0 : index
    %c2 = arith.constant 2 : index
    %c0_12 = arith.constant 0 : index
    %11 = vector.load %arg1[%c0_11, %c2, %c0_12] : memref<2x18x256xf32, #tpu.memory_space<vmem>>, vector<2x16x256xf32>
    %12 = vector.shape_cast %11 : vector<2x16x256xf32> to vector<32x256xf32>
    %c2_13 = arith.constant 2 : index
    %c0_14 = arith.constant 0 : index
    %c0_15 = arith.constant 0 : index
    %13 = vector.load %arg2[%c2_13, %c0_14, %c0_15] : memref<3x256x64xf32, #tpu.memory_space<vmem>>, vector<1x256x64xf32>
    %14 = vector.shape_cast %13 : vector<1x256x64xf32> to vector<256x64xf32>
    %cst_16 = arith.constant dense<0.000000e+00> : vector<32x64xf32>
    %15 = tpu.matmul %12, %14, %cst_16 {dimension_numbers = #tpu.dot_dimension_numbers<[1], [0], [0], [1], [0, 0, 1, 1], [], []>} : vector<32x256xf32>, vector<256x64xf32>, vector<32x64xf32> -> vector<32x64xf32>
    %16 = arith.addf %10, %15 : vector<32x64xf32>
    %c0_17 = arith.constant 0 : index
    %c0_18 = arith.constant 0 : index
    %17 = vector.load %arg3[%c0_17, %c0_18] : memref<1x64xf32, #tpu.memory_space<vmem>>, vector<1x64xf32>
    %18 = vector.broadcast %17 : vector<1x64xf32> to vector<32x64xf32>
    %19 = arith.addf %16, %18 : vector<32x64xf32>
    %cst_19 = arith.constant 0.000000e+00 : f32
    %20 = vector.broadcast %cst_19 : f32 to vector<32x64xf32>
    %21 = arith.maximumf %19, %20 : vector<32x64xf32>
    %cst_20 = arith.constant 0.000000e+00 : f32
    %22 = vector.broadcast %cst_20 : f32 to vector<2x1x64xf32>
    %c0_21 = arith.constant 0 : index
    %c0_22 = arith.constant 0 : index
    %c0_23 = arith.constant 0 : index
    %23 = vector.load %arg9[%c0_21, %c0_22, %c0_23] : memref<2x18x64xf32, #tpu.memory_space<vmem>>, vector<2x1x64xf32>
    tpu.vector_store %arg9[%c0_21, %c0_22, %c0_23], %22 {strides = array<i32>} : memref<2x18x64xf32, #tpu.memory_space<vmem>>, vector<2x1x64xf32>,
    %c0_24 = arith.constant 0 : index
    %c17 = arith.constant 17 : index
    %c0_25 = arith.constant 0 : index
    %24 = vector.load %arg9[%c0_24, %c17, %c0_25] : memref<2x18x64xf32, #tpu.memory_space<vmem>>, vector<2x1x64xf32>
    tpu.vector_store %arg9[%c0_24, %c17, %c0_25], %22 {strides = array<i32>} : memref<2x18x64xf32, #tpu.memory_space<vmem>>, vector<2x1x64xf32>,
    %25 = vector.shape_cast %21 : vector<32x64xf32> to vector<2x16x64xf32>
    %c0_26 = arith.constant 0 : index
    %c1_27 = arith.constant 1 : index
    %c0_28 = arith.constant 0 : index
    %26 = vector.load %arg9[%c0_26, %c1_27, %c0_28] : memref<2x18x64xf32, #tpu.memory_space<vmem>>, vector<2x16x64xf32>
    tpu.vector_store %arg9[%c0_26, %c1_27, %c0_28], %25 {strides = array<i32>} : memref<2x18x64xf32, #tpu.memory_space<vmem>>, vector<2x16x64xf32>,
    %c0_29 = arith.constant 0 : index
    %c0_30 = arith.constant 0 : index
    %c0_31 = arith.constant 0 : index
    %27 = vector.load %arg9[%c0_29, %c0_30, %c0_31] : memref<2x18x64xf32, #tpu.memory_space<vmem>>, vector<2x16x64xf32>
    %28 = vector.shape_cast %27 : vector<2x16x64xf32> to vector<32x64xf32>
    %c0_32 = arith.constant 0 : index
    %c0_33 = arith.constant 0 : index
    %c0_34 = arith.constant 0 : index
    %29 = vector.load %arg4[%c0_32, %c0_33, %c0_34] : memref<3x64x64xf32, #tpu.memory_space<vmem>>, vector<1x64x64xf32>
    %30 = vector.shape_cast %29 : vector<1x64x64xf32> to vector<64x64xf32>
    %cst_35 = arith.constant dense<0.000000e+00> : vector<32x64xf32>
    %31 = tpu.matmul %28, %30, %cst_35 {dimension_numbers = #tpu.dot_dimension_numbers<[1], [0], [0], [1], [0, 0, 1, 1], [], []>} : vector<32x64xf32>, vector<64x64xf32>, vector<32x64xf32> -> vector<32x64xf32>
    %c0_36 = arith.constant 0 : index
    %c1_37 = arith.constant 1 : index
    %c0_38 = arith.constant 0 : index
    %32 = vector.load %arg9[%c0_36, %c1_37, %c0_38] : memref<2x18x64xf32, #tpu.memory_space<vmem>>, vector<2x16x64xf32>
    %33 = vector.shape_cast %32 : vector<2x16x64xf32> to vector<32x64xf32>
    %c1_39 = arith.constant 1 : index
    %c0_40 = arith.constant 0 : index
    %c0_41 = arith.constant 0 : index
    %34 = vector.load %arg4[%c1_39, %c0_40, %c0_41] : memref<3x64x64xf32, #tpu.memory_space<vmem>>, vector<1x64x64xf32>
    %35 = vector.shape_cast %34 : vector<1x64x64xf32> to vector<64x64xf32>
    %cst_42 = arith.constant dense<0.000000e+00> : vector<32x64xf32>
    %36 = tpu.matmul %33, %35, %cst_42 {dimension_numbers = #tpu.dot_dimension_numbers<[1], [0], [0], [1], [0, 0, 1, 1], [], []>} : vector<32x64xf32>, vector<64x64xf32>, vector<32x64xf32> -> vector<32x64xf32>
    %37 = arith.addf %31, %36 : vector<32x64xf32>
    %c0_43 = arith.constant 0 : index
    %c2_44 = arith.constant 2 : index
    %c0_45 = arith.constant 0 : index
    %38 = vector.load %arg9[%c0_43, %c2_44, %c0_45] : memref<2x18x64xf32, #tpu.memory_space<vmem>>, vector<2x16x64xf32>
    %39 = vector.shape_cast %38 : vector<2x16x64xf32> to vector<32x64xf32>
    %c2_46 = arith.constant 2 : index
    %c0_47 = arith.constant 0 : index
    %c0_48 = arith.constant 0 : index
    %40 = vector.load %arg4[%c2_46, %c0_47, %c0_48] : memref<3x64x64xf32, #tpu.memory_space<vmem>>, vector<1x64x64xf32>
    %41 = vector.shape_cast %40 : vector<1x64x64xf32> to vector<64x64xf32>
    %cst_49 = arith.constant dense<0.000000e+00> : vector<32x64xf32>
    %42 = tpu.matmul %39, %41, %cst_49 {dimension_numbers = #tpu.dot_dimension_numbers<[1], [0], [0], [1], [0, 0, 1, 1], [], []>} : vector<32x64xf32>, vector<64x64xf32>, vector<32x64xf32> -> vector<32x64xf32>
    %43 = arith.addf %37, %42 : vector<32x64xf32>
    %c0_50 = arith.constant 0 : index
    %c0_51 = arith.constant 0 : index
    %44 = vector.load %arg5[%c0_50, %c0_51] : memref<1x64xf32, #tpu.memory_space<vmem>>, vector<1x64xf32>
    %45 = vector.broadcast %44 : vector<1x64xf32> to vector<32x64xf32>
    %46 = arith.addf %43, %45 : vector<32x64xf32>
    %cst_52 = arith.constant 0.000000e+00 : f32
    %47 = vector.broadcast %cst_52 : f32 to vector<32x64xf32>
    %48 = arith.maximumf %46, %47 : vector<32x64xf32>
    %c0_53 = arith.constant 0 : index
    %c0_54 = arith.constant 0 : index
    %49 = vector.load %arg6[%c0_53, %c0_54] : memref<32x16xf32, #tpu.memory_space<vmem>>, vector<32x16xf32>
    %c0_55 = arith.constant 0 : index
    %c0_56 = arith.constant 0 : index
    %50 = vector.load %arg7[%c0_55, %c0_56] : memref<64x128xf32, #tpu.memory_space<vmem>>, vector<64x128xf32>
    %51 = vector.extract_strided_slice %48 {offsets = [0, 0], sizes = [16, 64], strides = [1, 1]} : vector<32x64xf32> to vector<16x64xf32>
    %cst_57 = arith.constant dense<0.000000e+00> : vector<32x64xf32>
    %52 = tpu.matmul %49, %51, %cst_57 {dimension_numbers = #tpu.dot_dimension_numbers<[1], [0], [0], [1], [0, 0, 1, 1], [], []>} : vector<32x16xf32>, vector<16x64xf32>, vector<32x64xf32> -> vector<32x64xf32>
    %cst_58 = arith.constant dense<0.000000e+00> : vector<32x128xf32>
    %53 = tpu.matmul %52, %50, %cst_58 {dimension_numbers = #tpu.dot_dimension_numbers<[1], [0], [0], [1], [0, 0, 1, 1], [], []>} : vector<32x64xf32>, vector<64x128xf32>, vector<32x128xf32> -> vector<32x128xf32>
    %c0_59 = arith.constant 0 : index
    %c0_60 = arith.constant 0 : index
    %c0_61 = arith.constant 0 : index
    %54 = vector.load %arg8[%c0_59, %c0_60, %c0_61] : memref<2x32x128xf32, #tpu.memory_space<vmem>>, vector<1x32x128xf32>
    %55 = vector.shape_cast %54 : vector<1x32x128xf32> to vector<32x128xf32>
    %56 = vector.shape_cast %53 : vector<32x128xf32> to vector<1x32x128xf32>
    tpu.vector_store %arg8[%c0_59, %c0_60, %c0_61], %56 {strides = array<i32>} : memref<2x32x128xf32, #tpu.memory_space<vmem>>, vector<1x32x128xf32>,
    %57 = vector.extract_strided_slice %48 {offsets = [16, 0], sizes = [16, 64], strides = [1, 1]} : vector<32x64xf32> to vector<16x64xf32>
    %cst_62 = arith.constant dense<0.000000e+00> : vector<32x64xf32>
    %58 = tpu.matmul %49, %57, %cst_62 {dimension_numbers = #tpu.dot_dimension_numbers<[1], [0], [0], [1], [0, 0, 1, 1], [], []>} : vector<32x16xf32>, vector<16x64xf32>, vector<32x64xf32> -> vector<32x64xf32>
    %cst_63 = arith.constant dense<0.000000e+00> : vector<32x128xf32>
    %59 = tpu.matmul %58, %50, %cst_63 {dimension_numbers = #tpu.dot_dimension_numbers<[1], [0], [0], [1], [0, 0, 1, 1], [], []>} : vector<32x64xf32>, vector<64x128xf32>, vector<32x128xf32> -> vector<32x128xf32>
    %c1_64 = arith.constant 1 : index
    %c0_65 = arith.constant 0 : index
    %c0_66 = arith.constant 0 : index
    %60 = vector.load %arg8[%c1_64, %c0_65, %c0_66] : memref<2x32x128xf32, #tpu.memory_space<vmem>>, vector<1x32x128xf32>
    %61 = vector.shape_cast %60 : vector<1x32x128xf32> to vector<32x128xf32>
    %62 = vector.shape_cast %59 : vector<32x128xf32> to vector<1x32x128xf32>
    tpu.vector_store %arg8[%c1_64, %c0_65, %c0_66], %62 {strides = array<i32>} : memref<2x32x128xf32, #tpu.memory_space<vmem>>, vector<1x32x128xf32>,
    return
  }
  func.func @transform_0(%arg0: i32) -> (i32, i32, i32) {
    %c0_i32 = arith.constant 0 : i32
    %c0_i32_0 = arith.constant 0 : i32
    %c0_i32_1 = arith.constant 0 : i32
    return %arg0, %c0_i32, %c0_i32_0 : i32, i32, i32
  }
  func.func @transform_1(%arg0: i32) -> (i32, i32, i32) {
    %c0_i32 = arith.constant 0 : i32
    %c0_i32_0 = arith.constant 0 : i32
    %c0_i32_1 = arith.constant 0 : i32
    %c0_i32_2 = arith.constant 0 : i32
    return %c0_i32, %c0_i32_0, %c0_i32_1 : i32, i32, i32
  }
  func.func @transform_2(%arg0: i32) -> (i32, i32) {
    %c0_i32 = arith.constant 0 : i32
    %c0_i32_0 = arith.constant 0 : i32
    %c0_i32_1 = arith.constant 0 : i32
    return %c0_i32, %c0_i32_0 : i32, i32
  }
  func.func @transform_3(%arg0: i32) -> (i32, i32, i32) {
    %c0_i32 = arith.constant 0 : i32
    %c0_i32_0 = arith.constant 0 : i32
    %c0_i32_1 = arith.constant 0 : i32
    %c0_i32_2 = arith.constant 0 : i32
    return %c0_i32, %c0_i32_0, %c0_i32_1 : i32, i32, i32
  }
  func.func @transform_4(%arg0: i32) -> (i32, i32) {
    %c0_i32 = arith.constant 0 : i32
    %c0_i32_0 = arith.constant 0 : i32
    %c0_i32_1 = arith.constant 0 : i32
    return %c0_i32, %c0_i32_0 : i32, i32
  }
  func.func @transform_5(%arg0: i32) -> (i32, i32) {
    %c0_i32 = arith.constant 0 : i32
    %c0_i32_0 = arith.constant 0 : i32
    %c0_i32_1 = arith.constant 0 : i32
    return %c0_i32, %c0_i32_0 : i32, i32
  }
  func.func @transform_6(%arg0: i32) -> (i32, i32) {
    %c0_i32 = arith.constant 0 : i32
    %c0_i32_0 = arith.constant 0 : i32
    %c0_i32_1 = arith.constant 0 : i32
    return %c0_i32, %c0_i32_0 : i32, i32
  }
  func.func @transform_7(%arg0: i32) -> (i32, i32, i32) {
    %c0_i32 = arith.constant 0 : i32
    %c0_i32_0 = arith.constant 0 : i32
    %c0_i32_1 = arith.constant 0 : i32
    return %arg0, %c0_i32, %c0_i32_0 : i32, i32, i32
  }
}

</mosaic_0001>

<bundles_post_ra>
// kernel: tpu_custom_call.1
= control target key start
LH: loop header
LB: loop body
LE: loop exit
PB: predicated region body
PF: predicated region fallthrough
CT: control target
= control target key end

     0   :  { %vm87_vm0 = vcmask 1046528   ;;  %s1565_s0 = inlined_call_operand.vmem [shape: f32[2,18,256], index: 0, kind: input, shape index: {}]   ;;  %s1566_s1 = inlined_call_operand.vmem [shape: f32[3,256,64], index: 1, kind: input, shape index: {}]   ;;  %s1567_s2 = inlined_call_operand.vmem [shape: f32[1,64], index: 2, kind: input, shape index: {}]   ;;  %s1568_s3 = inlined_call_operand.vmem [shape: f32[3,64,64], index: 3, kind: input, shape index: {}]   ;;  %s1569_s4 = inlined_call_operand.vmem [shape: f32[1,64], index: 4, kind: input, shape index: {}]   ;;  %s1570_s5 = inlined_call_operand.vmem [shape: f32[32,16], index: 5, kind: input, shape index: {}]   ;;  %s1571_s6 = inlined_call_operand.vmem [shape: f32[64,128], index: 6, kind: input, shape index: {}]   ;;  %s1572_s7 = inlined_call_operand.hbm [shape: f32[2,32,128], index: 7, kind: output, shape index: {}]  }
   0x1   :  { %v811_v0 = vld [vmem:[%s1566_s1 + $0x178] sm:$0xff]  ;;  %v810_v3 = vld [vmem:[%s1566_s1 + $0x170] sm:$0xff]  ;;  %v809_v7 = vld [vmem:[%s1566_s1 + $0x168] sm:$0xff] }
   0x2   :  { %v827_v1 = vld [vmem:[%s1566_s1 + $0x1f8] sm:$0xff]  ;;  %149 = vmatpush.msra.mxu0 %v811_v0  ;;  %v826_v4 = vld [vmem:[%s1566_s1 + $0x1f0] sm:$0xff]  ;;  %v825_v8 = vld [vmem:[%s1566_s1 + $0x1e8] sm:$0xff] }
   0x3   :  { %v50_v2 = vld [vmem:[%s1566_s1 + $0x78] sm:$0xff]  ;;  %178 = vmatpush.msra.mxu1 %v827_v1  ;;  %v49_v5 = vld [vmem:[%s1566_s1 + $0x70] sm:$0xff]  ;;  %v48_v9 = vld [vmem:[%s1566_s1 + $0x68] sm:$0xff] }
   0x4   :  { %207 = vmatpush.msra.mxu2 %v50_v2  ;;  %v66_v6 = vld [vmem:[%s1566_s1 + $0xf8] sm:$0xff]  ;;  %150 = vmatpush.msra.mxu0 %v810_v3  ;;  %v65_v10 = vld [vmem:[%s1566_s1 + $0xf0] sm:$0xff]  ;;  %v808_v11 = vld [vmem:[%s1566_s1 + $0x160] sm:$0xff] }
   0x5   :  { %179 = vmatpush.msra.mxu1 %v826_v4  ;;  %236 = vmatpush.msra.mxu3 %v66_v6  ;;  %v824_v12 = vld [vmem:[%s1566_s1 + $0x1e0] sm:$0xff]  ;;  %v64_v14 = vld [vmem:[%s1566_s1 + $0xe8] sm:$0xff]  ;;  %v807_v15 = vld [vmem:[%s1566_s1 + $0x158] sm:$0xff] }
   0x6   :  { %208 = vmatpush.msra.mxu2 %v49_v5  ;;  %151 = vmatpush.msra.mxu0 %v809_v7  ;;  %v47_v13 = vld [vmem:[%s1566_s1 + $0x60] sm:$0xff]  ;;  %v823_v16 = vld [vmem:[%s1566_s1 + $0x1d8] sm:$0xff]  ;;  %v806_v19 = vld [vmem:[%s1566_s1 + $0x150] sm:$0xff] }
   0x7   :  { %180 = vmatpush.msra.mxu1 %v825_v8  ;;  %237 = vmatpush.msra.mxu3 %v65_v10  ;;  %v46_v17 = vld [vmem:[%s1566_s1 + $0x58] sm:$0xff]  ;;  %v63_v18 = vld [vmem:[%s1566_s1 + $0xe0] sm:$0xff]  ;;  %v822_v20 = vld [vmem:[%s1566_s1 + $0x1d0] sm:$0xff] }
   0x8   :  { %209 = vmatpush.msra.mxu2 %v48_v9  ;;  %152 = vmatpush.msra.mxu0 %v808_v11  ;;  %v45_v21 = vld [vmem:[%s1566_s1 + $0x50] sm:$0xff]  ;;  %v62_v22 = vld [vmem:[%s1566_s1 + $0xd8] sm:$0xff]  ;;  %v805_v23 = vld [vmem:[%s1566_s1 + $0x148] sm:$0xff] }
   0x9   :  { %181 = vmatpush.msra.mxu1 %v824_v12  ;;  %238 = vmatpush.msra.mxu3 %v64_v14  ;;  %v821_v24 = vld [vmem:[%s1566_s1 + $0x1c8] sm:$0xff]  ;;  %v61_v26 = vld [vmem:[%s1566_s1 + $0xd0] sm:$0xff]  ;;  %v804_v27 = vld [vmem:[%s1566_s1 + $0x140] sm:$0xff] }
   0xa   :  { %210 = vmatpush.msra.mxu2 %v47_v13  ;;  %153 = vmatpush.msra.mxu0 %v807_v15  ;;  %v44_v25 = vld [vmem:[%s1566_s1 + $0x48] sm:$0xff]  ;;  %v820_v28 = vld [vmem:[%s1566_s1 + $0x1c0] sm:$0xff]  ;;  %v803_v31 = vld [vmem:[%s1566_s1 + $0x138] sm:$0xff] }
   0xb   :  { %182 = vmatpush.msra.mxu1 %v823_v16  ;;  %239 = vmatpush.msra.mxu3 %v63_v18  ;;  %v43_v29 = vld [vmem:[%s1566_s1 + $0x40] sm:$0xff]  ;;  %v60_v30 = vld [vmem:[%s1566_s1 + $0xc8] sm:$0xff]  ;;  %v819_v32 = vld [vmem:[%s1566_s1 + $0x1b8] sm:$0xff] }
   0xc   :  { %211 = vmatpush.msra.mxu2 %v46_v17  ;;  %154 = vmatpush.msra.mxu0 %v806_v19  ;;  %v42_v33 = vld [vmem:[%s1566_s1 + $0x38] sm:$0xff]  ;;  %v59_v34 = vld [vmem:[%s1566_s1 + $0xc0] sm:$0xff]  ;;  %v802_v35 = vld [vmem:[%s1566_s1 + $0x130] sm:$0xff] }
   0xd   :  { %183 = vmatpush.msra.mxu1 %v822_v20  ;;  %240 = vmatpush.msra.mxu3 %v62_v22  ;;  %v818_v36 = vld [vmem:[%s1566_s1 + $0x1b0] sm:$0xff]  ;;  %v58_v38 = vld [vmem:[%s1566_s1 + $0xb8] sm:$0xff]  ;;  %v801_v39 = vld [vmem:[%s1566_s1 + $0x128] sm:$0xff] }
   0xe   :  { %212 = vmatpush.msra.mxu2 %v45_v21  ;;  %155 = vmatpush.msra.mxu0 %v805_v23  ;;  %v41_v37 = vld [vmem:[%s1566_s1 + $0x30] sm:$0xff]  ;;  %v817_v40 = vld [vmem:[%s1566_s1 + $0x1a8] sm:$0xff]  ;;  %v800_v43 = vld [vmem:[%s1566_s1 + $0x120] sm:$0xff] }
   0xf   :  { %184 = vmatpush.msra.mxu1 %v821_v24  ;;  %241 = vmatpush.msra.mxu3 %v61_v26  ;;  %v40_v41 = vld [vmem:[%s1566_s1 + $0x28] sm:$0xff]  ;;  %v57_v42 = vld [vmem:[%s1566_s1 + $0xb0] sm:$0xff]  ;;  %v816_v44 = vld [vmem:[%s1566_s1 + $0x1a0] sm:$0xff] }
  0x10   :  { %213 = vmatpush.msra.mxu2 %v44_v25  ;;  %156 = vmatpush.msra.mxu0 %v804_v27  ;;  %v39_v45 = vld [vmem:[%s1566_s1 + $0x20] sm:$0xff]  ;;  %v56_v46 = vld [vmem:[%s1566_s1 + $0xa8] sm:$0xff]  ;;  %v799_v47 = vld [vmem:[%s1566_s1 + $0x118] sm:$0xff] }
  0x11   :  { %185 = vmatpush.msra.mxu1 %v820_v28  ;;  %242 = vmatpush.msra.mxu3 %v60_v30  ;;  %v815_v48 = vld [vmem:[%s1566_s1 + $0x198] sm:$0xff]  ;;  %v55_v50 = vld [vmem:[%s1566_s1 + $0xa0] sm:$0xff]  ;;  %v1160_v51 = vld [vmem:[%s1565_s0 + $0x10] sm:$0xff] }
  0x12   :  { %214 = vmatpush.msra.mxu2 %v43_v29  ;;  %157 = vmatpush.msra.mxu0 %v803_v31  ;;  %v38_v49 = vld [vmem:[%s1566_s1 + $0x18] sm:$0xff]  ;;  %v67_v52 = vld [vmem:[%s1565_s0] sm:$0xfe]  ;;  %v68_v54 = vld [vmem:[%s1565_s0 + $0x8] sm:$0xfe]  ;;  %v89_v62 = vrot.slane %v1160_v51, 1 }
  0x13   :  { %186 = vmatpush.msra.mxu1 %v819_v32  ;;  %243 = vmatpush.msra.mxu3 %v59_v34  ;;  %v1168_v53 = vld [vmem:[%s1565_s0 + $0x18] sm:$0xff]  ;;  %v798_v55 = vld [vmem:[%s1566_s1 + $0x110] sm:$0xff]  ;;  %v797_v59 = vld [vmem:[%s1566_s1 + $0x108] sm:$0xff]  ;;  %v88_v61 = vrot.slane %v67_v52, 1  ;;  %v91_v63 = vrot.slane %v68_v54, 1 }
  0x14   :  { %215 = vmatpush.msra.mxu2 %v42_v33  ;;  %158 = vmatpush.msra.mxu0 %v802_v35  ;;  %v814_v56 = vld [vmem:[%s1566_s1 + $0x190] sm:$0xff]  ;;  %v54_v58 = vld [vmem:[%s1566_s1 + $0x98] sm:$0xff]  ;;  %v813_v60 = vld [vmem:[%s1566_s1 + $0x188] sm:$0xff]  ;;  %v92_v0 = vrot.slane %v1168_v53, 1 }
  0x15   :  { %187 = vmatpush.msra.mxu1 %v818_v36  ;;  %244 = vmatpush.msra.mxu3 %v58_v38  ;;  %v37_v57 = vld [vmem:[%s1566_s1 + $0x10] sm:$0xff]  ;;  %v36_v1 = vld [vmem:[%s1566_s1 + $0x8] sm:$0xff]  ;;  %v796_v3 = vld [vmem:[%s1566_s1 + $0x100] sm:$0xff]  ;;  %v90_v7 = vsel %vm87_vm0, %v88_v61, %v89_v62 }
  0x16   :  { %216 = vmatpush.msra.mxu2 %v41_v37  ;;  %159 = vmatpush.msra.mxu0 %v801_v39  ;;  %v53_v2 = vld [vmem:[%s1566_s1 + $0x90] sm:$0xff]  ;;  %v812_v4 = vld [vmem:[%s1566_s1 + $0x180] sm:$0xff]  ;;  %v52_v6 = vld [vmem:[%s1566_s1 + $0x88] sm:$0xff]  ;;  %v93_v8 = vsel %vm87_vm0, %v91_v63, %v92_v0 }
  0x17   :  { %188 = vmatpush.msra.mxu1 %v817_v40  ;;  %245 = vmatpush.msra.mxu3 %v57_v42  ;;  %v35_v5 = vld [vmem:[%s1566_s1] sm:$0xff]  ;;  %v843_v11 = vld [vmem:[%s1566_s1 + $0x278] sm:$0xff]  ;;  %v70_v14 = vld [vmem:[%s1565_s0 + $0x28] sm:$0x1] }
  0x18   :  { %217 = vmatpush.msra.mxu2 %v40_v41  ;;  %160 = vmatpush.msra.mxu0 %v800_v43  ;;  %v27_v9 = vld [vmem:[%s1565_s0] sm:$0xff]  ;;  %v859_v12 = vld [vmem:[%s1566_s1 + $0x2f8] sm:$0xff]  ;;  %v28_v15 = vld [vmem:[%s1565_s0 + $0x8] sm:$0xff]  ;;  %v96_v19 = vrot.slane %v70_v14, 1 }
  0x19   :  { %189 = vmatpush.msra.mxu1 %v816_v44  ;;  %246 = vmatpush.msra.mxu3 %v56_v46  ;;  %v51_v10 = vld [vmem:[%s1566_s1 + $0x80] sm:$0xff]  ;;  %v842_v16 = vld [vmem:[%s1566_s1 + $0x270] sm:$0xff]  ;;  %v841_v20 = vld [vmem:[%s1566_s1 + $0x268] sm:$0xff] }
  0x1a   :  { %218 = vmatpush.msra.mxu2 %v39_v45  ;;  %161 = vmatpush.msra.mxu0 %v799_v47  ;;  %v69_v13 = vld [vmem:[%s1565_s0 + $0x20] sm:$0x1]  ;;  %v858_v17 = vld [vmem:[%s1566_s1 + $0x2f0] sm:$0xff]  ;;  %v857_v21 = vld [vmem:[%s1566_s1 + $0x2e8] sm:$0xff]  ;;  %v97_v25 = vsel %vm87_vm0, %v92_v0, %v96_v19 }
  0x1b   :  { %190 = vmatpush.msra.mxu1 %v815_v48  ;;  %247 = vmatpush.msra.mxu3 %v55_v50  ;;  %v94_v18 = vrot.slane %v69_v13, 1  ;;  %v840_v22 = vld [vmem:[%s1566_s1 + $0x260] sm:$0xff]  ;;  %v839_v26 = vld [vmem:[%s1566_s1 + $0x258] sm:$0xff]  ;;  %v71_v28 = vld [vmem:[%s1565_s0 + $0x30] sm:$0xfe] }
  0x1c   :  { %219 = vmatpush.msra.mxu2 %v38_v49  ;;  %162 = vmatpush.msra.mxu0 %v798_v55  ;;  %v856_v23 = vld [vmem:[%s1566_s1 + $0x2e0] sm:$0xff] }
  0x1d   :  { %191 = vmatpush.msra.mxu1 %v814_v56  ;;  %248 = vmatpush.msra.mxu3 %v54_v58  ;;  %v95_v24 = vsel %vm87_vm0, %v89_v62, %v94_v18  ;;  %v1260_v27 = vld [vmem:[%s1565_s0 + $0x40] sm:$0xff] }
  0x1e   :  { %220 = vmatpush.msra.mxu2 %v37_v57  ;;  %163 = vmatpush.msra.mxu0 %v797_v59 }
  0x1f   :  { %192 = vmatpush.msra.mxu1 %v813_v60  ;;  %249 = vmatpush.msra.mxu3 %v53_v2 }
  0x20   :  { %221 = vmatpush.msra.mxu2 %v36_v1  ;;  %164 = vmatpush.msra.mxu0 %v796_v3 }
  0x21   :  { %193 = vmatpush.msra.mxu1 %v812_v4  ;;  %250 = vmatpush.msra.mxu3 %v52_v6 }
  0x22   :  { %222 = vmatpush.msra.mxu2 %v35_v5  ;;  %165 = vmatmul.f32.vlgmr.msra.gmra.mxu0 %v90_v7 }
  0x23   :  { %194 = vmatmul.f32.vlgmr.msra.gmra.mxu1 %v93_v8  ;;  %223 = vmatmul.f32.vlgmr.msra.gmra.mxu2 %v27_v9 }
  0x24   :  { %251 = vmatpush.msra.mxu3 %v51_v10  ;;  %343 = vmatpush.msrb.mxu0 %v843_v11 }
  0x25   :  { %372 = vmatpush.msrb.mxu1 %v859_v12  ;;  %252 = vmatmul.f32.vlgmr.msra.gmra.mxu3 %v28_v15 }
  0x26   :  { %344 = vmatpush.msrb.mxu0 %v842_v16 }
  0x27   :  { %373 = vmatpush.msrb.mxu1 %v858_v17 }
  0x28   :  { %345 = vmatpush.msrb.mxu0 %v841_v20 }
  0x29   :  { %374 = vmatpush.msrb.mxu1 %v857_v21 }
  0x2a   :  { %12 = vsyncpa [#allocation4], 0  ;;  %346 = vmatpush.msrb.mxu0 %v840_v22  ;;  %v855_v29 = vld [vmem:[%s1566_s1 + $0x2d8] sm:$0xff]  ;;  %v1271_v30 = vld [vmem:[%s1565_s0 + $0x48] sm:$0xff]  ;;  %v98_v34 = vrot.slane %v71_v28, 1  ;;  %v99_v35 = vrot.slane %v1260_v27, 1 }
  0x2b   :  { %375 = vmatpush.msrb.mxu1 %v856_v23  ;;  %v72_v31 = vld [vmem:[%s1565_s0 + $0x38] sm:$0xfe]  ;;  %168 = vmatmul.f32.gmra.mxu0 %v95_v24  ;;  %v838_v32 = vld [vmem:[%s1566_s1 + $0x250] sm:$0xff]  ;;  %v837_v36 = vld [vmem:[%s1566_s1 + $0x248] sm:$0xff]  ;;  %v102_v38 = vrot.slane %v1271_v30, 1  ;;  %v283_v5 = vrot.slane %v1160_v51, 2 }
  0x2c   :  { %197 = vmatmul.f32.gmra.mxu1 %v97_v25  ;;  %226 = vmatmul.f32.gmra.mxu2 %v1160_v51  ;;  %v854_v33 = vld [vmem:[%s1566_s1 + $0x2d0] sm:$0xff]  ;;  %v101_v37 = vrot.slane %v72_v31, 1  ;;  %v853_v39 = vld [vmem:[%s1566_s1 + $0x2c8] sm:$0xff]  ;;  %v836_v40 = vld [vmem:[%s1566_s1 + $0x240] sm:$0xff]  ;;  %v100_v42 = vsel %vm87_vm0, %v98_v34, %v99_v35  ;;  %vm281_vm1 = vcmask 1045504   ;;  %v286_v8 = vrot.slane %v1168_v53, 2 }
  0x2d   :  { %347 = vmatpush.msrb.mxu0 %v839_v26  ;;  %376 = vmatpush.msrb.mxu1 %v855_v29  ;;  %v852_v41 = vld [vmem:[%s1566_s1 + $0x2c0] sm:$0xff]  ;;  %v31_v44 = vld [vmem:[%s1565_s0 + $0x30] sm:$0xff]  ;;  %v835_v45 = vld [vmem:[%s1566_s1 + $0x238] sm:$0xff]  ;;  %v293_v21 = vrot.slane %v1260_v27, 2  ;;  %v296_v23 = vrot.slane %v1271_v30, 2  ;;  %vm417_vm2 = vcmask 516096  }
  0x2e   :  { %255 = vmatmul.f32.gmra.mxu3 %v1168_v53  ;;  %v103_v43 = vsel %vm87_vm0, %v101_v37, %v102_v38  ;;  %v851_v46 = vld [vmem:[%s1566_s1 + $0x2b8] sm:$0xff]  ;;  %v73_v47 = vld [vmem:[%s1565_s0 + $0x50] sm:$0x1]  ;;  %v833_v56 = vld [vmem:[%s1566_s1 + $0x228] sm:$0xff]  ;;  %vm422_vm3 = vcmask 523264   ;;  %vm616_vm4 = vcmask 130048  }
  0x2f   :  { %348 = vmatpush.msrb.mxu0 %v838_v32  ;;  %377 = vmatpush.msrb.mxu1 %v854_v33  ;;  %v74_v48 = vld [vmem:[%s1565_s0 + $0x58] sm:$0x1]  ;;  %v834_v50 = vld [vmem:[%s1566_s1 + $0x230] sm:$0xff]  ;;  %v104_v54 = vrot.slane %v73_v47, 1  ;;  %v849_v57 = vld [vmem:[%s1566_s1 + $0x2a8] sm:$0xff]  ;;  %v960_v47 = vmov 0.0  }
  0x30   :  { %v32_v49 = vld [vmem:[%s1565_s0 + $0x38] sm:$0xff]  ;;  %v850_v52 = vld [vmem:[%s1566_s1 + $0x2b0] sm:$0xff]  ;;  %v106_v55 = vrot.slane %v74_v48, 1  ;;  %v832_v58 = vld [vmem:[%s1566_s1 + $0x220] sm:$0xff]  ;;  %418 = vst.msk [vmem:[#allocation2] sm:$0x1] %vm417_vm2, %v960_v47 }
  0x31   :  { %349 = vmatpush.msrb.mxu0 %v837_v36  ;;  %378 = vmatpush.msrb.mxu1 %v853_v39  ;;  %v848_v59 = vld [vmem:[%s1566_s1 + $0x2a0] sm:$0xff]  ;;  %v105_v60 = vsel %vm87_vm0, %v99_v35, %v104_v54  ;;  %v831_v62 = vld [vmem:[%s1566_s1 + $0x218] sm:$0xff]  ;;  %v266_v1 = vld [vmem:[%s1565_s0 + $0x8] sm:$0xfc]  ;;  %419 = vst.msk [vmem:[#allocation2 + $0x18] sm:$0x1] %vm417_vm2, %v960_v47 }
  0x32   :  { %v107_v61 = vsel %vm87_vm0, %v102_v38, %v106_v55  ;;  %v265_v63 = vld [vmem:[%s1565_s0] sm:$0xfc]  ;;  %v847_v0 = vld [vmem:[%s1566_s1 + $0x298] sm:$0xff]  ;;  %v830_v2 = vld [vmem:[%s1566_s1 + $0x210] sm:$0xff]  ;;  %v285_v7 = vrot.slane %v266_v1, 2  ;;  %s962_s9 = smov 128  }
  0x33   :  { %350 = vmatpush.msrb.mxu0 %v836_v40  ;;  %379 = vmatpush.msrb.mxu1 %v852_v41  ;;  %v846_v3 = vld [vmem:[%s1566_s1 + $0x290] sm:$0xff]  ;;  %v282_v4 = vrot.slane %v265_v63, 2  ;;  %v829_v6 = vld [vmem:[%s1566_s1 + $0x208] sm:$0xff]  ;;  %v828_v51 = vld [vmem:[%s1566_s1 + $0x200] sm:$0xff]  ;;  %420 = vst.msk [vmem:[#allocation2 + $0x11] sm:$0x1] %vm417_vm2, %v960_v47 }
  0x34   :  { %171 = vmatmul.f32.gmra.mxu0 %v100_v42  ;;  %200 = vmatmul.f32.gmra.mxu1 %v103_v43  ;;  %v845_v9 = vld [vmem:[%s1566_s1 + $0x288] sm:$0xff]  ;;  %v844_v10 = vld [vmem:[%s1566_s1 + $0x280] sm:$0xff]  ;;  %v287_v53 = vsel %vm281_vm1, %v285_v7, %v286_v8  ;;  %v269_v18 = vld [vmem:[%s1565_s0 + $0x30] sm:$0xfc]  ;;  %421 = vst.msk [vmem:[#allocation2 + $0x29] sm:$0x1] %vm417_vm2, %v960_v47 }
  0x35   :  { %229 = vmatmul.f32.gmra.mxu2 %v31_v44  ;;  %351 = vmatpush.msrb.mxu0 %v835_v45  ;;  %v284_v11 = vsel %vm281_vm1, %v282_v4, %v283_v5  ;;  %v267_v12 = vld [vmem:[%s1565_s0 + $0x20] sm:$0x3]  ;;  %v268_v13 = vld [vmem:[%s1565_s0 + $0x28] sm:$0x3]  ;;  %v270_v19 = vld [vmem:[%s1565_s0 + $0x38] sm:$0xfc] }
  0x36   :  { %380 = vmatpush.msrb.mxu1 %v851_v46  ;;  %258 = vmatmul.f32.gmra.mxu3 %v32_v49  ;;  %v288_v14 = vrot.slane %v267_v12, 2  ;;  %v290_v15 = vrot.slane %v268_v13, 2  ;;  %v292_v20 = vrot.slane %v269_v18, 2  ;;  %v295_v22 = vrot.slane %v270_v19, 2  ;;  %v271_v26 = vld [vmem:[%s1565_s0 + $0x50] sm:$0x3] }
  0x37   :  { %352 = vmatpush.msrb.mxu0 %v834_v50  ;;  %v272_v28 = vld [vmem:[%s1565_s0 + $0x58] sm:$0x3]  ;;  %v298_v29 = vrot.slane %v271_v26, 2  ;;  %v437_v33 = vld [vmem:[%s1568_s3 + $0x30] sm:$0xff]  ;;  %v436_v37 = vld [vmem:[%s1568_s3 + $0x28] sm:$0xff]  ;;  %s963_s10 = smov 8  }
  0x38   :  { %381 = vmatpush.msrb.mxu1 %v850_v52  ;;  %v289_v16 = vsel %vm281_vm1, %v283_v5, %v288_v14  ;;  %v291_v17 = vsel %vm281_vm1, %v286_v8, %v290_v15  ;;  %v294_v24 = vsel %vm281_vm1, %v292_v20, %v293_v21  ;;  %v297_v25 = vsel %vm281_vm1, %v295_v22, %v296_v23  ;;  %v438_v32 = vld [vmem:[%s1568_s3 + $0x38] sm:$0xff]  ;;  %v866_v38 = vld [vmem:[%s1568_s3 + $0x70] sm:$0xff]  ;;  %v865_v39 = vld [vmem:[%s1568_s3 + $0x68] sm:$0xff] }
  0x39   :  { %353 = vmatpush.msrb.mxu0 %v833_v56  ;;  %v300_v31 = vrot.slane %v272_v28, 2  ;;  %513 = vmatpush.msrb.mxu3 %v438_v32  ;;  %v867_v34 = vld [vmem:[%s1568_s3 + $0x78] sm:$0xff]  ;;  %v435_v42 = vld [vmem:[%s1568_s3 + $0x20] sm:$0xff]  ;;  %v433_v48 = vld [vmem:[%s1568_s3 + $0x10] sm:$0xff] }
  0x3a   :  { %382 = vmatpush.msrb.mxu1 %v849_v57  ;;  %472 = vmatpush.msrb.mxu2 %v867_v34  ;;  %v864_v43 = vld [vmem:[%s1568_s3 + $0x60] sm:$0xff]  ;;  %v434_v44 = vld [vmem:[%s1568_s3 + $0x18] sm:$0xff]  ;;  %v862_v49 = vld [vmem:[%s1568_s3 + $0x50] sm:$0xff] }
  0x3b   :  { %354 = vmatpush.msrb.mxu0 %v832_v58  ;;  %514 = vmatpush.msrb.mxu3 %v437_v33  ;;  %v863_v45 = vld [vmem:[%s1568_s3 + $0x58] sm:$0xff]  ;;  %v882_v50 = vld [vmem:[%s1568_s3 + $0xb0] sm:$0xff]  ;;  %v861_v52 = vld [vmem:[%s1568_s3 + $0x48] sm:$0xff] }
  0x3c   :  { %383 = vmatpush.msrb.mxu1 %v848_v59  ;;  %174 = vmatmul.f32.gmra.mxu0 %v105_v60  ;;  %v883_v46 = vld [vmem:[%s1568_s3 + $0xb8] sm:$0xff]  ;;  %v432_v54 = vld [vmem:[%s1568_s3 + $0x8] sm:$0xff]  ;;  %v860_v58 = vld [vmem:[%s1568_s3 + $0x40] sm:$0xff] }
  0x3d   :  { %203 = vmatmul.f32.gmra.mxu1 %v107_v61  ;;  %232 = vmatmul.f32.gmra.mxu2 %v1260_v27  ;;  %v299_v27 = vsel %vm281_vm1, %v293_v21, %v298_v29  ;;  %v881_v55 = vld [vmem:[%s1568_s3 + $0xa8] sm:$0xff]  ;;  %v431_v59 = vld [vmem:[%s1568_s3] sm:$0xff]  ;;  %v879_v61 = vld [vmem:[%s1568_s3 + $0x98] sm:$0xff] }
  0x3e   :  { %355 = vmatpush.msrb.mxu0 %v831_v62  ;;  %384 = vmatpush.msrb.mxu1 %v847_v0  ;;  %v880_v60 = vld [vmem:[%s1568_s3 + $0xa0] sm:$0xff]  ;;  %v878_v62 = vld [vmem:[%s1568_s3 + $0x90] sm:$0xff]  ;;  %v877_v0 = vld [vmem:[%s1568_s3 + $0x88] sm:$0xff] }
  0x3f   :  { %261 = vmatmul.f32.gmra.mxu3 %v1271_v30  ;;  %v301_v30 = vsel %vm281_vm1, %v296_v23, %v300_v31  ;;  %473 = vmatpush.msrb.mxu2 %v866_v38 }
  0x40   :  { %356 = vmatpush.msrb.mxu0 %v830_v2  ;;  %385 = vmatpush.msrb.mxu1 %v846_v3  ;;  %v876_v3 = vld [vmem:[%s1568_s3 + $0x80] sm:$0xff] }
  0x41   :  { %515 = vmatpush.msrb.mxu3 %v436_v37  ;;  %474 = vmatpush.msrb.mxu2 %v865_v39 }
  0x42   :  { %357 = vmatpush.msrb.mxu0 %v829_v6  ;;  %386 = vmatpush.msrb.mxu1 %v845_v9 }
  0x43   :  { %516 = vmatpush.msrb.mxu3 %v435_v42  ;;  %475 = vmatpush.msrb.mxu2 %v864_v43 }
  0x44   :  { %358 = vmatpush.msrb.mxu0 %v828_v51  ;;  %387 = vmatpush.msrb.mxu1 %v844_v10 }
  0x45   :  { %359 = vmatmul.f32.vlgmr.msrb.gmra.mxu0 %v284_v11  ;;  %388 = vmatmul.f32.vlgmr.msrb.gmra.mxu1 %v287_v53  ;;  %v932_v11 = vld [vmem:[%s1567_s2] ss:$0 sm:$0xff]  ;;  %s784_s2 = sshll.u32 %s1572_s7, 4  ;;  %s785_s2 = int_to_ptr.hbm [resolvable:$true] %s784_s2 }
  0x46   :  { %517 = vmatpush.msrb.mxu3 %v434_v44  ;;  %476 = vmatpush.msrb.mxu2 %v863_v45 }
  0x47   :  { %567 = vmatpush.msra.mxu0 %v883_v46  ;;  %904 = vmatpush.msra.mxu1 %v883_v46 }
  0x48   :  { %518 = vmatpush.msrb.mxu3 %v433_v48  ;;  %477 = vmatpush.msrb.mxu2 %v862_v49 }
  0x49   :  { %568 = vmatpush.msra.mxu0 %v882_v50  ;;  %906 = vmatpush.msra.mxu1 %v882_v50 }
  0x4a   :  { %478 = vmatpush.msrb.mxu2 %v861_v52  ;;  %519 = vmatpush.msrb.mxu3 %v432_v54 }
  0x4b   :  { %569 = vmatpush.msra.mxu0 %v881_v55  ;;  %908 = vmatpush.msra.mxu1 %v881_v55 }
  0x4c   :  { %479 = vmatpush.msrb.mxu2 %v860_v58  ;;  %520 = vmatpush.msrb.mxu3 %v431_v59 }
  0x4d   :  { %362 = vmatmul.f32.gmra.mxu0 %v289_v16  ;;  %391 = vmatmul.f32.gmra.mxu1 %v291_v17 }
  0x4e   :  { %570 = vmatpush.msra.mxu0 %v880_v60  ;;  %905 = vmatpush.msra.mxu3 %v883_v46 }
  0x4f   :  { %910 = vmatpush.msra.mxu1 %v880_v60 }
  0x50   :  { %571 = vmatpush.msra.mxu0 %v879_v61  ;;  %907 = vmatpush.msra.mxu3 %v882_v50 }
  0x51   :  { %912 = vmatpush.msra.mxu1 %v879_v61 }
  0x52   :  { %572 = vmatpush.msra.mxu0 %v878_v62  ;;  %909 = vmatpush.msra.mxu3 %v881_v55 }
  0x53   :  { %914 = vmatpush.msra.mxu1 %v878_v62 }
  0x54   :  { %573 = vmatpush.msra.mxu0 %v877_v0  ;;  %911 = vmatpush.msra.mxu3 %v880_v60 }
  0x55   :  { %365 = vmatmul.f32.gmra.mxu0 %v294_v24  ;;  %394 = vmatmul.f32.gmra.mxu1 %v297_v25 }
  0x56   :  { %916 = vmatpush.msra.mxu1 %v877_v0  ;;  %574 = vmatpush.msra.mxu0 %v876_v3 }
  0x57   :  { %913 = vmatpush.msra.mxu3 %v879_v61 }
  0x58   :  { %918 = vmatpush.msra.mxu1 %v876_v3 }
  0x59   :  { %915 = vmatpush.msra.mxu3 %v878_v62 }
  0x5b   :  { %917 = vmatpush.msra.mxu3 %v877_v0 }
  0x5d   :  { %368 = vmatmul.f32.gmra.mxu0 %v299_v27  ;;  %397 = vmatmul.f32.gmra.mxu1 %v301_v30 }
  0x5e   :  { %919 = vmatpush.msra.mxu3 %v876_v3 }
  0x9f   :  { %v1409_v35 = vpop.f32.mrf.mxu0 }
  0xa0   :  { %v1411_v36 = vpop.f32.mrf.mxu1 }
  0xa1   :  { %v196_v5 = vadd.f32 %v1411_v36, %v1409_v35 }
  0xa6   :  { %v224_v63 = vpop.f32.mrf.mxu2 }
  0xa7   :  { %v225_v6 = vadd.f32 %v224_v63, %v196_v5 }
  0xa8   :  { %v1422_v40 = vpop.f32.mrf.mxu0  ;;  %v253_v4 = vpop.f32.mrf.mxu3 }
  0xa9   :  { %v1424_v41 = vpop.f32.mrf.mxu1  ;;  %v254_v51 = vadd.f32 %v253_v4, %v225_v6  ;;  %v933_v4 = vld [vmem:[%s1569_s4] ss:$0 sm:$0xff] }
  0xaa   :  { %v199_v12 = vadd.f32 %v1424_v41, %v1422_v40 }
  0xaf   :  { %v227_v7 = vpop.f32.mrf.mxu2 }
  0xb0   :  { %v228_v14 = vadd.f32 %v227_v7, %v199_v12 }
  0xb1   :  { %v172_v56 = vpop.f32.mrf.mxu0  ;;  %v201_v57 = vpop.f32.mrf.mxu1 }
  0xb2   :  { %v256_v53 = vpop.f32.mrf.mxu3  ;;  %v202_v22 = vadd.f32 %v201_v57, %v172_v56 }
  0xb3   :  { %v257_v20 = vadd.f32 %v256_v53, %v228_v14  ;;  %v604_v53 = vld [vmem:[%s1570_s5] sm:$0xff] }
  0xb8   :  { %v230_v18 = vpop.f32.mrf.mxu2 }
  0xb9   :  { %v175_v1 = vpop.f32.mrf.mxu0  ;;  %v231_v25 = vadd.f32 %v230_v18, %v202_v22  ;;  %v615_v22 = vld [vmem:[%s1571_s6 + $0x38] sm:$0xff] }
  0xba   :  { %v204_v2 = vpop.f32.mrf.mxu1  ;;  %v259_v24 = vpop.f32.mrf.mxu3  ;;  %678 = vmatpush.msra.mxu2 %v615_v22  ;;  %752 = vmatpush.msrb.mxu0 %v615_v22 }
  0xbb   :  { %v260_v32 = vadd.f32 %v259_v24, %v231_v25  ;;  %v205_v35 = vadd.f32 %v204_v2, %v175_v1 }
  0xc0   :  { %v233_v34 = vpop.f32.mrf.mxu2 }
  0xc1   :  { %v234_v37 = vadd.f32 %v233_v34, %v205_v35  ;;  %v608_v34 = vld [vmem:[%s1571_s6] sm:$0xff] }
  0xc2   :  { %v360_v8 = vpop.f32.mrf.mxu0  ;;  %v389_v9 = vpop.f32.mrf.mxu1 }
  0xc3   :  { %v390_v10 = vadd.f32 %v389_v9, %v360_v8  ;;  %v262_v39 = vpop.f32.mrf.mxu3 }
  0xc4   :  { %v263_v46 = vadd.f32 %v262_v39, %v234_v37 }
  0xc5   :  { %v401_v13 = vadd.f32 %v390_v10, %v254_v51 }
  0xc7   :  { %v409_v15 = vadd.f32 %v932_v11, %v401_v13  ;;  %v605_v13 = vld [vmem:[%s1570_s5 + $0x8] sm:$0xff] }
  0xc9   :  { %v413_v16 = vmax.f32 %v409_v15, 0.0 }
  0xca   :  { %v363_v17 = vpop.f32.mrf.mxu0  ;;  %v392_v19 = vpop.f32.mrf.mxu1 }
  0xcb   :  { %423 = vst.msk [vmem:[#allocation2 + $0x1] sm:$0xff] %vm422_vm3, %v413_v16  ;;  %v393_v21 = vadd.f32 %v392_v19, %v363_v17 }
  0xcd   :  { %v402_v23 = vadd.f32 %v393_v21, %v257_v20  ;;  %v606_v21 = vld [vmem:[%s1570_s5 + $0x10] sm:$0xff] }
  0xcf   :  { %v410_v26 = vadd.f32 %v932_v11, %v402_v23  ;;  %v614_v23 = vld [vmem:[%s1571_s6 + $0x30] sm:$0xff] }
  0xd0   :  { %679 = vmatpush.msra.mxu2 %v614_v23  ;;  %753 = vmatpush.msrb.mxu0 %v614_v23 }
  0xd1   :  { %v414_v28 = vmax.f32 %v410_v26, 0.0  ;;  %v613_v26 = vld [vmem:[%s1571_s6 + $0x28] sm:$0xff] }
  0xd2   :  { %v366_v29 = vpop.f32.mrf.mxu0  ;;  %v395_v31 = vpop.f32.mrf.mxu1  ;;  %v439_v27 = vld [vmem:[#allocation2 + $0x1] sm:$0xff]  ;;  %680 = vmatpush.msra.mxu2 %v613_v26  ;;  %754 = vmatpush.msrb.mxu0 %v613_v26 }
  0xd3   :  { %v427_v30 = vld [vmem:[#allocation2] sm:$0xff]  ;;  %424 = vst.msk [vmem:[#allocation2 + $0x9] sm:$0xff] %vm422_vm3, %v414_v28  ;;  %v396_v33 = vadd.f32 %v395_v31, %v366_v29  ;;  %868 = vmatmul.msk.f32.vlgmr.msrb.gmra.mxu2 %vm422_vm3, %v439_v27  ;;  %v611_v27 = vld [vmem:[%s1571_s6 + $0x18] sm:$0xff] }
  0xd4   :  { %872 = vmatmul.msk.f32.vlgmr.msrb.gmra.mxu3 %vm422_vm3, %v427_v30  ;;  %v612_v29 = vld [vmem:[%s1571_s6 + $0x20] sm:$0xff]  ;;  %v607_v30 = vld [vmem:[%s1570_s5 + $0x18] sm:$0xff]  ;;  %s961_s5 = smov [#allocation3]  }
  0xd5   :  { %v403_v36 = vadd.f32 %v396_v33, %v260_v32  ;;  %681 = vmatpush.msra.mxu2 %v612_v29  ;;  %v610_v32 = vld [vmem:[%s1571_s6 + $0x10] sm:$0xff]  ;;  %755 = vmatpush.msrb.mxu0 %v612_v29  ;;  %v609_v33 = vld [vmem:[%s1571_s6 + $0x8] sm:$0xff]  ;;  %s782_s6 = sshll.u32 %s961_s5, 4  ;;  %s783_s6 = int_to_ptr.vmem [resolvable:$true] %s782_s6 }
  0xd7   :  { %v411_v38 = vadd.f32 %v932_v11, %v403_v36  ;;  %682 = vmatpush.msra.mxu2 %v611_v27  ;;  %756 = vmatpush.msrb.mxu0 %v611_v27 }
  0xd9   :  { %v415_v40 = vmax.f32 %v411_v38, 0.0  ;;  %683 = vmatpush.msra.mxu2 %v610_v32  ;;  %757 = vmatpush.msrb.mxu0 %v610_v32 }
  0xda   :  { %v369_v41 = vpop.f32.mrf.mxu0  ;;  %v398_v42 = vpop.f32.mrf.mxu1  ;;  %v440_v43 = vld [vmem:[#allocation2 + $0x9] sm:$0xff] }
  0xdb   :  { %v428_v44 = vld [vmem:[#allocation2 + $0x8] sm:$0xff]  ;;  %425 = vst.msk [vmem:[#allocation2 + $0x19] sm:$0xff] %vm422_vm3, %v415_v40  ;;  %v399_v47 = vadd.f32 %v398_v42, %v369_v41  ;;  %869 = vmatmul.msk.f32.gmra.mxu2 %vm422_vm3, %v440_v43  ;;  %758 = vmatpush.msrb.mxu0 %v609_v33 }
  0xdc   :  { %v534_v45 = vld [vmem:[#allocation2 + $0x2] sm:$0xff]  ;;  %873 = vmatmul.msk.f32.gmra.mxu3 %vm422_vm3, %v428_v44  ;;  %v535_v55 = vld [vmem:[#allocation2 + $0xa] sm:$0xff]  ;;  %684 = vmatpush.msra.mxu2 %v609_v33 }
  0xdd   :  { %884 = vmatmul.msk.f32.vlgmr.msra.gmra.mxu0 %vm422_vm3, %v534_v45  ;;  %v404_v48 = vadd.f32 %v399_v47, %v263_v46 }
  0xde   :  { %685 = vmatpush.msra.mxu2 %v608_v34  ;;  %759 = vmatpush.msrb.mxu0 %v608_v34 }
  0xdf   :  { %v412_v49 = vadd.f32 %v932_v11, %v404_v48 }
  0xe0   :  { %920 = vmatpush.msrb.mxu2 %v615_v22 }
  0xe1   :  { %v416_v50 = vmax.f32 %v412_v49, 0.0 }
  0xe2   :  { %v441_v52 = vld [vmem:[#allocation2 + $0x19] sm:$0xff]  ;;  %921 = vmatpush.msrb.mxu2 %v614_v23 }
  0xe3   :  { %v429_v54 = vld [vmem:[#allocation2 + $0x18] sm:$0xff]  ;;  %426 = vst.msk [vmem:[#allocation2 + $0x21] sm:$0xff] %vm422_vm3, %v416_v50  ;;  %870 = vmatmul.msk.f32.gmra.mxu2 %vm422_vm3, %v441_v52 }
  0xe4   :  { %874 = vmatmul.msk.f32.gmra.mxu3 %vm422_vm3, %v429_v54  ;;  %922 = vmatpush.msrb.mxu2 %v613_v26 }
  0xe5   :  { %885 = vmatmul.msk.f32.gmra.mxu0 %vm422_vm3, %v535_v55 }
  0xe6   :  { %923 = vmatpush.msrb.mxu2 %v612_v29 }
  0xe8   :  { %924 = vmatpush.msrb.mxu2 %v611_v27 }
  0xea   :  { %v442_v56 = vld [vmem:[#allocation2 + $0x21] sm:$0xff]  ;;  %925 = vmatpush.msrb.mxu2 %v610_v32 }
  0xeb   :  { %v430_v57 = vld [vmem:[#allocation2 + $0x20] sm:$0xff]  ;;  %871 = vmatmul.msk.f32.gmra.mxu2 %vm422_vm3, %v442_v56 }
  0xec   :  { %v536_v58 = vld [vmem:[#allocation2 + $0x1a] sm:$0xff]  ;;  %875 = vmatmul.msk.f32.gmra.mxu3 %vm422_vm3, %v430_v57  ;;  %v537_v59 = vld [vmem:[#allocation2 + $0x22] sm:$0xff]  ;;  %926 = vmatpush.msrb.mxu2 %v609_v33 }
  0xed   :  { %886 = vmatmul.msk.f32.vlgmr.msra.gmra.mxu1 %vm422_vm3, %v536_v58 }
  0xee   :  { %927 = vmatpush.msrb.mxu2 %v608_v34 }
  0xf4   :  { %887 = vmatmul.msk.f32.vlgmr.msra.gmra.mxu3 %vm422_vm3, %v537_v59 }
 0x156   :  { %v481_v60 = vpop.f32.mrf.mxu2 }
 0x157   :  { %v522_v61 = vpop.f32.mrf.mxu3 }
 0x158   :  { %v523_v63 = vadd.f32 %v522_v61, %v481_v60 }
 0x15a   :  { %v576_v62 = vpop.f32.mrf.mxu0 }
 0x15b   :  { %v588_v3 = vadd.f32 %v576_v62, %v523_v63 }
 0x15d   :  { %v596_v7 = vadd.f32 %v933_v4, %v588_v3 }
 0x15e   :  { %v484_v0 = vpop.f32.mrf.mxu2 }
 0x15f   :  { %v525_v1 = vpop.f32.mrf.mxu3  ;;  %v600_v10 = vmax.f32 %v596_v7, 0.0 }
 0x160   :  { %v526_v2 = vadd.f32 %v525_v1, %v484_v0 }
 0x162   :  { %v579_v5 = vpop.f32.mrf.mxu0 }
 0x163   :  { %v589_v6 = vadd.f32 %v579_v5, %v526_v2 }
 0x165   :  { %v597_v8 = vadd.f32 %v933_v4, %v589_v6 }
 0x166   :  { %v487_v11 = vpop.f32.mrf.mxu2 }
 0x167   :  { %v601_v9 = vmax.f32 %v597_v8, 0.0  ;;  %v528_v51 = vpop.f32.mrf.mxu3 }
 0x168   :  { %v529_v14 = vadd.f32 %v528_v51, %v487_v11 }
 0x169   :  { %643 = vmatpush.msrb.mxu1 %v601_v9 }
 0x16a   :  { %v582_v15 = vpop.f32.mrf.mxu1 }
 0x16b   :  { %644 = vmatpush.msrb.mxu1 %v600_v10  ;;  %v590_v17 = vadd.f32 %v582_v15, %v529_v14 }
 0x16c   :  { %888 = vmatmul.msk.f32.vlgmr.msrb.gmra.mxu1 %vm616_vm4, %v604_v53 }
 0x16d   :  { %v598_v24 = vadd.f32 %v933_v4, %v590_v17 }
 0x16e   :  { %v490_v16 = vpop.f32.mrf.mxu2 }
 0x16f   :  { %v531_v12 = vpop.f32.mrf.mxu3  ;;  %v602_v31 = vmax.f32 %v598_v24, 0.0 }
 0x170   :  { %v532_v18 = vadd.f32 %v531_v12, %v490_v16 }
 0x174   :  { %889 = vmatmul.msk.f32.gmra.mxu1 %vm616_vm4, %v605_v13 }
 0x177   :  { %v585_v19 = vpop.f32.mrf.mxu3 }
 0x178   :  { %v591_v20 = vadd.f32 %v585_v19, %v532_v18 }
 0x17a   :  { %v599_v25 = vadd.f32 %v933_v4, %v591_v20 }
 0x17c   :  { %v603_v28 = vmax.f32 %v599_v25, 0.0  ;;  %890 = vmatmul.msk.f32.gmra.mxu1 %vm616_vm4, %v606_v21 }
 0x17e   :  { %717 = vmatpush.msrb.mxu3 %v603_v28 }
 0x180   :  { %718 = vmatpush.msrb.mxu3 %v602_v31 }
 0x181   :  { %896 = vmatmul.msk.f32.vlgmr.msrb.gmra.mxu3 %vm616_vm4, %v604_v53 }
 0x184   :  { %891 = vmatmul.msk.f32.gmra.mxu1 %vm616_vm4, %v607_v30 }
 0x189   :  { %897 = vmatmul.msk.f32.gmra.mxu3 %vm616_vm4, %v605_v13 }
 0x191   :  { %898 = vmatmul.msk.f32.gmra.mxu3 %vm616_vm4, %v606_v21 }
 0x199   :  { %899 = vmatmul.msk.f32.gmra.mxu3 %vm616_vm4, %v607_v30 }
 0x1e9   :  { %v646_v35 = vpop.f32.mrf.mxu1 }
 0x1ea   :  { %892 = vmatmul.msk.f32.vlgmr.msra.gmra.mxu2 %vm422_vm3, %v646_v35 }
 0x1f1   :  { %v649_v36 = vpop.f32.mrf.mxu1 }
 0x1f2   :  { %893 = vmatmul.msk.f32.gmra.mxu2 %vm422_vm3, %v649_v36 }
 0x1f9   :  { %v652_v37 = vpop.f32.mrf.mxu1 }
 0x1fa   :  { %894 = vmatmul.msk.f32.gmra.mxu2 %vm422_vm3, %v652_v37 }
 0x201   :  { %v655_v38 = vpop.f32.mrf.mxu1 }
 0x202   :  { %895 = vmatmul.msk.f32.gmra.mxu2 %vm422_vm3, %v655_v38 }
 0x204   :  { %v720_v39 = vpop.f32.mrf.mxu3 }
 0x205   :  { %900 = vmatmul.msk.f32.vlgmr.msrb.gmra.mxu0 %vm422_vm3, %v720_v39 }
 0x20c   :  { %v723_v40 = vpop.f32.mrf.mxu3 }
 0x20d   :  { %901 = vmatmul.msk.f32.gmra.mxu0 %vm422_vm3, %v723_v40 }
 0x214   :  { %v726_v41 = vpop.f32.mrf.mxu3 }
 0x215   :  { %902 = vmatmul.msk.f32.gmra.mxu0 %vm422_vm3, %v726_v41 }
 0x21c   :  { %v729_v42 = vpop.f32.mrf.mxu3 }
 0x21d   :  { %903 = vmatmul.msk.f32.vlgmr.msrb.gmra.mxu2 %vm422_vm3, %v729_v42 }
 0x26d   :  { %v687_v43 = vpop.f32.mrf.mxu2 }
 0x26e   :  { %699 = vst [vmem:[#allocation3] sm:$0xff] %v687_v43 }
 0x275   :  { %v690_v44 = vpop.f32.mrf.mxu2 }
 0x276   :  { %700 = vst [vmem:[#allocation3 + $0x8] sm:$0xff] %v690_v44 }
 0x27d   :  { %v693_v45 = vpop.f32.mrf.mxu2 }
 0x27e   :  { %701 = vst [vmem:[#allocation3 + $0x10] sm:$0xff] %v693_v45 }
 0x282   :  { %v761_v46 = vpop.f32.mrf.mxu0 }
 0x283   :  { %774 = vst [vmem:[#allocation3 + $0x20] sm:$0xff] %v761_v46 }
 0x285   :  { %v696_v47 = vpop.f32.mrf.mxu2 }
 0x286   :  { %702 = vst [vmem:[#allocation3 + $0x18] sm:$0xff] %v696_v47 }
 0x28a   :  { %v764_v48 = vpop.f32.mrf.mxu0 }
 0x28b   :  { %775 = vst [vmem:[#allocation3 + $0x28] sm:$0xff] %v764_v48 }
 0x292   :  { %v767_v49 = vpop.f32.mrf.mxu0 }
 0x293   :  { %776 = vst [vmem:[#allocation3 + $0x30] sm:$0xff] %v767_v49 }
 0x2a0   :  { %v770_v50 = vpop.f32.mrf.mxu2 }
 0x2a1   :  { %777 = vst [vmem:[#allocation3 + $0x38] sm:$0xff] %v770_v50 }
 0x2a2   :  { %790 = dma.vmem_to_hbm [thread:$0]  %s783_s6, 1024, %s785_s2, [#allocation4], %s962_s9, %s962_s9, %s963_s10  }
 0x2a3   :  { %958 = dma.done.wait [#allocation4], 1024  }
 0x2a4   :  { %959 = vsyncadd [#allocation4], 4294966272 }
 0x2a5   :  { %795 = vsyncpa [#allocation4], 1 }

</bundles_post_ra>
